<compile_context>
chip_gen: v7x
topology: tpu7x:2x2x1
jax: 0.10.0
libtpu: 0.0.40
codegen_flags: <defaults>
</compile_context>

<pallas_src>
import functools

import jax
import jax.numpy as jnp
from jax.experimental import pallas as pl
from jax.experimental.pallas import tpu as pltpu


_SPLIT_BYTES = 2 * 1024 * 1024      # force >=2 grid steps above this (v7x: 2 TCs)
_VMEM_LIMIT_BYTES = 32 * 1024 * 1024


def _leaky_clamp_math(x, cap, negative_slope):
    # Literal composition of the PyTorch module:
    #   y = LeakyReLU(x); out = -LeakyReLU(-y + cap) + cap
    y = jnp.where(x >= 0, x, negative_slope * x)
    t = cap - y                                   # == -y + cap
    t = jnp.where(t >= 0, t, negative_slope * t)  # LeakyReLU
    return cap - t                                # == -t + cap


def _leaky_clamp_kernel(x_ref, o_ref, *, cap, negative_slope):
    x = x_ref[...]
    o_ref[...] = _leaky_clamp_math(x, cap, negative_slope).astype(o_ref.dtype)


def _round_up(n, m):
    return ((n + m - 1) // m) * m


def _leaky_clamp_2d(x2d, cap, negative_slope, block_bytes, donate):
    rows, lane = x2d.shape
    itemsize = x2d.dtype.itemsize
    nbytes = rows * lane * itemsize

    # Target rows per block (multiple of 8) from the per-buffer byte budget.
    target_rows = max(8, (block_bytes // (lane * itemsize)) // 8 * 8)

    if rows > 2 * target_rows:
        block_rows = target_rows                       # long grid of full tiles
    elif nbytes >= _SPLIT_BYTES and rows >= 16:
        # Mid-sized input: make (at least) 2 grid steps so both v7x
        # TensorCores get work.
        block_rows = _round_up(pl.cdiv(rows, 2), 8)
    else:
        # Small input: one full-extent block (legal even if rows % 8 != 0).
        block_rows = rows

    grid = (pl.cdiv(rows, block_rows),)  # ragged edge block is masked by Pallas

    kernel = functools.partial(
        _leaky_clamp_kernel,
        cap=float(cap),
        negative_slope=float(negative_slope),
    )

    return pl.pallas_call(
        kernel,
        out_shape=jax.ShapeDtypeStruct(x2d.shape, x2d.dtype),
        grid_spec=pl.GridSpec(
            grid=grid,
            in_specs=[pl.BlockSpec((block_rows, lane), lambda i: (i, 0))],
            out_specs=pl.BlockSpec((block_rows, lane), lambda i: (i, 0)),
        ),
        compiler_params=pltpu.CompilerParams(
            dimension_semantics=("parallel",),
            vmem_limit_bytes=_VMEM_LIMIT_BYTES,
        ),
        input_output_aliases=({0: 0} if donate else {}),
    )(x2d)


def leaky_clamp(x, cap, negative_slope=0.01, *,
                block_bytes=4 * 1024 * 1024, donate=False):
    """Leaky clamp: LeakyReLU followed by a leaky upper clamp at `cap`.

    `x` is any-shaped float array; returns the same shape/dtype.  `cap` and
    `negative_slope` are Python floats baked into the kernel at trace time
    (they are fixed at nn.Module construction time in the PyTorch original).
    Set `donate=True` only if the caller no longer needs `x`.
    """
    orig_shape = x.shape
    total = x.size
    if total == 0:
        return x
    flat = x.reshape(-1)

    # Lane-dense layout: pick the widest lane width (multiple of 128) that
    # divides the element count, so no padding or trailing slice is needed.
    lane = None
    for cand in (512, 256, 128):
        if total % cand == 0:
            lane = cand
            break

    if lane is not None:
        out2d = _leaky_clamp_2d(flat.reshape(total // lane, lane), cap,
                                negative_slope, block_bytes, donate)
        return out2d.reshape(orig_shape)

    # Element count not a multiple of 128: run the bulk through the kernel and
    # the tiny (<128 element) remainder through plain jnp.  Only this rare
    # path pays an extra copy (slice + concat); the full tensor is never padded.
    head = (total // 128) * 128
    if head == 0:
        return _leaky_clamp_math(x, float(cap), float(negative_slope))
    head_out = _leaky_clamp_2d(flat[:head].reshape(head // 128, 128), cap,
                               negative_slope, block_bytes, donate=False)
    tail_out = _leaky_clamp_math(flat[head:], float(cap), float(negative_slope))
    return jnp.concatenate([head_out.reshape(-1), tail_out]).reshape(orig_shape)


def leaky_clamp_ref(x, cap, negative_slope=0.01):
    """Pure-JAX reference mirroring the PyTorch module exactly."""
    return _leaky_clamp_math(x, float(cap), float(negative_slope))


if __name__ == "__main__":
    cap = 1.0  # the module's __init__ argument

    # Small NCHW feature map consistent with the module's conv-style usage.
    x = jax.random.normal(jax.random.PRNGKey(0), (2, 4, 16, 16),
                          dtype=jnp.float32) * 3.0
    out = jax.block_until_ready(leaky_clamp(x, cap))
    ref = leaky_clamp_ref(x, cap)
    assert out.shape == x.shape and out.dtype == x.dtype
    assert jnp.allclose(out, ref, atol=1e-6, rtol=1e-6)

    # Ragged multi-block path: rows not a multiple of block_rows (masked edge
    # block), lane = 128 (total divisible by 128 but not 256/512).
    x2 = jax.random.normal(jax.random.PRNGKey(1), (3, 5, 24, 16),
                           dtype=jnp.float32) * 3.0
    out2 = jax.block_until_ready(leaky_clamp(x2, cap, block_bytes=8 * 1024))
    assert jnp.allclose(out2, leaky_clamp_ref(x2, cap), atol=1e-6, rtol=1e-6)

    # Odd element count -> kernel head + tiny jnp tail epilogue (no full pad).
    x3 = jax.random.normal(jax.random.PRNGKey(2), (3, 7, 33, 65),
                           dtype=jnp.float32) * 3.0
    out3 = jax.block_until_ready(leaky_clamp(x3, cap))
    assert jnp.allclose(out3, leaky_clamp_ref(x3, cap), atol=1e-6, rtol=1e-6)

    # Mid-sized input (>= 2 MiB): exercises the >=2-grid-step split path.
    x4 = jax.random.normal(jax.random.PRNGKey(3), (8, 8, 96, 96),
                           dtype=jnp.float32) * 3.0
    out4 = jax.block_until_ready(leaky_clamp(x4, cap))
    assert jnp.allclose(out4, leaky_clamp_ref(x4, cap), atol=1e-6, rtol=1e-6)

    print("KERNEL_OK")
</pallas_src>

<mosaic_0001>
module attributes {stable_mosaic.version = 11 : i64} {
  func.func @_leaky_clamp_kernel(%arg0: i32, %arg1: memref<4x512xf32, #tpu.memory_space<vmem>>, %arg2: memref<4x512xf32, #tpu.memory_space<vmem>>) attributes {dimension_semantics = [#tpu.dimension_semantics<parallel>], iteration_bounds = array<i64: 1>, scalar_prefetch = 0 : i64, scratch_operands = 0 : i64, tpu.core_type = #tpu.core_type<tc>, window_params = [{transform_indices = @transform_0, window_bounds = array<i64: 4, 512>}, {transform_indices = @transform_1, window_bounds = array<i64: 4, 512>}]} {
    %c0 = arith.constant 0 : index
    %c0_0 = arith.constant 0 : index
    %0 = vector.load %arg1[%c0, %c0_0] : memref<4x512xf32, #tpu.memory_space<vmem>>, vector<4x512xf32>
    %cst = arith.constant 0.000000e+00 : f32
    %1 = vector.broadcast %cst : f32 to vector<4x512xf32>
    %2 = arith.cmpf oge, %0, %1 : vector<4x512xf32>
    %cst_1 = arith.constant 0.00999999977 : f32
    %3 = vector.broadcast %cst_1 : f32 to vector<4x512xf32>
    %4 = arith.mulf %3, %0 : vector<4x512xf32>
    %5 = arith.select %2, %0, %4 : vector<4x512xi1>, vector<4x512xf32>
    %cst_2 = arith.constant 1.000000e+00 : f32
    %6 = vector.broadcast %cst_2 : f32 to vector<4x512xf32>
    %7 = arith.subf %6, %5 : vector<4x512xf32>
    %cst_3 = arith.constant 0.000000e+00 : f32
    %8 = vector.broadcast %cst_3 : f32 to vector<4x512xf32>
    %9 = arith.cmpf oge, %7, %8 : vector<4x512xf32>
    %cst_4 = arith.constant 0.00999999977 : f32
    %10 = vector.broadcast %cst_4 : f32 to vector<4x512xf32>
    %11 = arith.mulf %10, %7 : vector<4x512xf32>
    %12 = arith.select %9, %7, %11 : vector<4x512xi1>, vector<4x512xf32>
    %cst_5 = arith.constant 1.000000e+00 : f32
    %13 = vector.broadcast %cst_5 : f32 to vector<4x512xf32>
    %14 = arith.subf %13, %12 : vector<4x512xf32>
    %c0_6 = arith.constant 0 : index
    %c0_7 = arith.constant 0 : index
    %15 = vector.load %arg2[%c0_6, %c0_7] : memref<4x512xf32, #tpu.memory_space<vmem>>, vector<4x512xf32>
    tpu.vector_store %arg2[%c0_6, %c0_7], %14 {strides = array<i32>} : memref<4x512xf32, #tpu.memory_space<vmem>>, vector<4x512xf32>,
    return
  }
  func.func @transform_0(%arg0: i32) -> (i32, i32) {
    %c0_i32 = arith.constant 0 : i32
    %c0_i32_0 = arith.constant 0 : i32
    return %arg0, %c0_i32 : i32, i32
  }
  func.func @transform_1(%arg0: i32) -> (i32, i32) {
    %c0_i32 = arith.constant 0 : i32
    %c0_i32_0 = arith.constant 0 : i32
    return %arg0, %c0_i32 : i32, i32
  }
}

</mosaic_0001>

<bundles_post_ra>
// kernel: tpu_custom_call.1
= control target key start
LH: loop header
LB: loop body
LE: loop exit
PB: predicated region body
PF: predicated region fallthrough
CT: control target
= control target key end

     0   :  { %6 = vsyncpa [#allocation3], 0  ;;  %s142_s0 = inlined_call_operand.hbm [shape: f32[4,512], index: 0, kind: input, shape index: {}]   ;;  %s143_s1 = inlined_call_operand.hbm [shape: f32[4,512], index: 1, kind: output, shape index: {}]  }
   0x1   :  { %7 = vsyncpa [#allocation4], 0  ;;  %s106_s6 = smov [#allocation2]   ;;  %s58_s10 = scalar_lea.hbm %s142_s0, 256 }
   0x2   :  { %s14_s7 = sshll.u32 %s106_s6, 4  ;;  %p59_p0 = scmp.ne.s32.totalorder %s142_s0, %s58_s10  ;;  %s15_s7 = int_to_ptr.vmem [resolvable:$true] %s14_s7 }
   0x3   :  { %p62_p1 = scmp.lt.u32.totalorder %s58_s10, %s142_s0 }
   0x5   :  { %p64_p2 = pnand %p62_p1, %p59_p0 }
   0x7   :  { %67 = shalt.err (!%p64_p2)
}
   0x8   :  { %s68_s15 = scalar_lea.vmem %s15_s7, 256  ;;  %p73_p4 = scmp.lt.s32.totalorder %s15_s7, %s15_s7 }
   0x9   :  { %p69_p3 = scmp.ne.s32.totalorder %s15_s7, %s68_s15  ;;  %p74_p5 = scmp.lt.s32.totalorder %s68_s15, %s68_s15 }
   0xb   :  { %p75_p6 = por %p74_p5, %p73_p4 }
   0xd   :  { %p76_p7 = pnand %p75_p6, %p69_p3 }
   0xf   :  { %79 = shalt.err (!%p76_p7)
}
  0x10   :  { %17 = dma.hbm_to_vmem [thread:$0]  %s142_s0, 256, %s15_s7, [#allocation3]  }
  0x11   :  { %102 = dma.done.wait [#allocation3], 256  }
  0x12   :  { %103 = vsyncadd [#allocation3], 4294967040  ;;  %v21_v0 = vld [vmem:[#allocation2] sm:$0xff]  ;;  %v22_v1 = vld [vmem:[#allocation2 + $0x8] sm:$0xff]  ;;  %s107_s18 = smov [#allocation5]  }
  0x13   :  { %vm23_vm0 = vcmp.ge.f32.partialorder %v21_v0, 0.0  ;;  %v25_v2 = vmul.f32 0.01, %v21_v0  ;;  %vm24_vm1 = vcmp.ge.f32.partialorder %v22_v1, 0.0  ;;  %v26_v3 = vmul.f32 0.01, %v22_v1 }
  0x14   :  { %s47_s19 = sshll.u32 %s107_s18, 4  ;;  %s48_s19 = int_to_ptr.vmem [resolvable:$true] %s47_s19 }
  0x15   :  { %v27_v4 = vsel %vm23_vm0, %v21_v0, %v25_v2  ;;  %v28_v5 = vsel %vm24_vm1, %v22_v1, %v26_v3  ;;  %s80_s0 = scalar_lea.vmem %s48_s19, 256  ;;  %p85_p9 = scmp.lt.s32.totalorder %s48_s19, %s48_s19 }
  0x16   :  { %v29_v6 = vsub.f32 1.0, %v27_v4  ;;  %v30_v7 = vsub.f32 1.0, %v28_v5  ;;  %p81_p8 = scmp.ne.s32.totalorder %s48_s19, %s80_s0  ;;  %p86_p10 = scmp.lt.s32.totalorder %s80_s0, %s80_s0 }
  0x18   :  { %vm31_vm2 = vcmp.ge.f32.partialorder %v29_v6, 0.0  ;;  %v33_v8 = vmul.f32 0.01, %v29_v6  ;;  %vm32_vm3 = vcmp.ge.f32.partialorder %v30_v7, 0.0  ;;  %v34_v9 = vmul.f32 0.01, %v30_v7  ;;  %p87_p11 = por %p86_p10, %p85_p9 }
  0x1a   :  { %v35_v10 = vsel %vm31_vm2, %v29_v6, %v33_v8  ;;  %v36_v11 = vsel %vm32_vm3, %v30_v7, %v34_v9  ;;  %p88_p12 = pnand %p87_p11, %p81_p8 }
  0x1b   :  { %v37_v12 = vsub.f32 1.0, %v35_v10  ;;  %v38_v13 = vsub.f32 1.0, %v36_v11 }
  0x1d   :  { %39 = vst [vmem:[#allocation5] sm:$0xff] %v37_v12  ;;  %40 = vst [vmem:[#allocation5 + $0x8] sm:$0xff] %v38_v13 }
  0x1e   :  { %91 = shalt.err (!%p88_p12)
}
  0x1f   :  { %s92_s22 = scalar_lea.hbm %s143_s1, 256 }
  0x20   :  { %p93_p13 = scmp.ne.s32.totalorder %s143_s1, %s92_s22  ;;  %p96_p0 = scmp.lt.u32.totalorder %s92_s22, %s143_s1 }
  0x22   :  { %p98_p1 = pnand %p96_p0, %p93_p13 }
  0x24   :  { %101 = shalt.err (!%p98_p1)
}
  0x25   :  { %50 = dma.vmem_to_hbm [thread:$0]  %s48_s19, 256, %s143_s1, [#allocation4]  }
  0x26   :  { %104 = dma.done.wait [#allocation4], 256  }
  0x27   :  { %105 = vsyncadd [#allocation4], 4294967040 }
  0x28   :  { %54 = vsyncpa [#allocation3], 1 }
  0x29   :  { %55 = vsyncpa [#allocation4], 1 }

</bundles_post_ra>
